<compile_context>
chip_gen: v7x
topology: tpu7x:2x2x1
jax: 0.10.0
libtpu: 0.0.40
codegen_flags: <defaults>
</compile_context>

<pallas_src>
import functools
import math

import jax
import jax.numpy as jnp
import numpy as np
from jax.experimental import pallas as pl
from jax.experimental.pallas import tpu as pltpu


def _round_up(x, m):
    return ((x + m - 1) // m) * m


def _resident_spec(shape):
    """BlockSpec for a VMEM-resident (constant block index) input.

    Single-buffered via pipeline_mode=pl.Buffered(1) when the installed JAX
    supports it (double-buffering a constant block is pure VMEM waste).
    """
    index_map = lambda *_: (0,) * len(shape)
    try:
        return pl.BlockSpec(shape, index_map, pipeline_mode=pl.Buffered(1))
    except Exception:  # older JAX without pipeline_mode / Buffered
        return pl.BlockSpec(shape, index_map)


def _topk_sparsify(pre, top_k):
    """Per-row top-k masking: keep values >= the k-th largest value, else 0.

    Used both inside the Pallas kernel and by the pure-JAX reference so the
    selection semantics are identical.
    """
    work = pre
    thresh = jnp.max(work, axis=-1, keepdims=True)
    for _ in range(top_k - 1):          # static unroll; elementwise math f32
        work = jnp.where(work >= thresh, -jnp.inf, work)
        thresh = jnp.max(work, axis=-1, keepdims=True)
    return jnp.where(pre >= thresh, pre, 0.0)


# --------------------------------------------------------------------------
# Phase 1: top-k sparse encoder + fused mu/lv heads (batch-tiled, "parallel").
# --------------------------------------------------------------------------
def _encode_kernel(data_ref, w_enc_ref, b_enc_ref, w_mulv_ref, b_mulv_ref,
                   mulv_ref, *, top_k):
    # bf16 matmul operands, f32 MXU accumulation; all elementwise math in f32
    # (v5e has no bf16 VPU/EUP).
    data = data_ref[...].astype(jnp.bfloat16)
    pre = jnp.dot(data, w_enc_ref[...],
                  preferred_element_type=jnp.float32) + b_enc_ref[...]

    sparse = _topk_sparsify(pre, top_k)

    # Fused heads: one (bt, NCp) @ (NCp, 2*Lp) matmul instead of two (NCp, Lp).
    mulv_ref[...] = jnp.dot(sparse.astype(jnp.bfloat16), w_mulv_ref[...],
                            preferred_element_type=jnp.float32) + b_mulv_ref[...]


# --------------------------------------------------------------------------
# Phase 2: BatchNorm (precomputed full-batch stats) + sample + KL + dropout
#          + softmax, batch-tiled, one packed lane-dense output slab.
# --------------------------------------------------------------------------
def _latent_kernel(mulv_ref, mean_ref, var_ref, g_ref, be_ref, eps_ref,
                   keep_ref, out_ref, *, n_latent, n_latent_pad, prior_var,
                   prior_logvar, mu_bn_eps, lv_bn_eps, dropout_p):
    L, Lp = n_latent, n_latent_pad
    bt = out_ref.shape[0]

    mulv = mulv_ref[...]                                     # (bt, 2*Lp) f32

    # BatchNorm1d, training mode. mean/var are full-batch statistics computed
    # in the wrapper, so batch-tiling this kernel keeps them exact.
    col2 = jax.lax.broadcasted_iota(jnp.int32, (1, 2 * Lp), 1)
    bn_eps = jnp.where(col2 < Lp, mu_bn_eps, lv_bn_eps)      # 1e-4 mu / 1e-3 lv
    mulv_bn = (mulv - mean_ref[...]) * jax.lax.rsqrt(var_ref[...] + bn_eps) \
        * g_ref[...] + be_ref[...]

    mu, lv = mulv[:, :Lp], mulv[:, Lp:]                      # aligned slices
    mu_bn, lv_bn = mulv_bn[:, :Lp], mulv_bn[:, Lp:]

    col = jax.lax.broadcasted_iota(jnp.int32, (1, Lp), 1)
    valid = col < L                                          # lane-pad mask

    # KL term on the pre-BN mu / lv (matches the torch ordering).
    inv_pv = 1.0 / prior_var
    kl_el = jnp.exp(lv) * inv_pv + mu * mu * inv_pv + (prior_logvar - lv)
    kl = 0.5 * (jnp.sum(jnp.where(valid, kl_el, 0.0), axis=1, keepdims=True)
                - float(L))

    # Reparameterised sample + inverted dropout (training mode); eps and the
    # 0/1 keep mask are kernel inputs.
    z = (mu_bn + jnp.exp(0.5 * lv_bn) * eps_ref[...]) \
        * keep_ref[...] * (1.0 / (1.0 - dropout_p))

    # Softmax over the valid latent columns only (exact normalization).
    z = jnp.where(valid, z, -jnp.inf)
    z = z - jnp.max(z, axis=1, keepdims=True)
    e = jnp.exp(z)
    soft = e / jnp.sum(e, axis=1, keepdims=True)

    # One packed, lane-dense store: [softmax (Lp lanes) | KL bcast (128 lanes)].
    out_ref[...] = jnp.concatenate(
        [soft, jnp.broadcast_to(kl, (bt, 128))], axis=1)


# --------------------------------------------------------------------------
# Wrapper
# --------------------------------------------------------------------------
def concept_logistic_gaussian_forward(data, params, noise, keep_mask, *,
                                      top_k, dr=0.1, alpha=1.0,
                                      batch_block=256):
    """Training-mode forward; returns (softmax(z), KL) like the torch module.

    `noise` ~ N(0,1) of shape (B, n_latent) and `keep_mask` in {0,1} of shape
    (B, n_latent) play the roles of torch's Normal sample and Dropout mask.
    """
    f32 = jnp.float32
    B, enc_size = data.shape
    n_concepts, n_latent = params["w_mu"].shape
    L = n_latent
    prior_var = 1.0 / alpha - 2.0 / L + 1.0 / (L * L)
    prior_logvar = math.log(prior_var)

    # ---- lane / MXU aligned padded sizes ---------------------------------
    LANE = 128            # lane width; 256 is ideal for the v6e/v7x MXU
    ENCp = _round_up(enc_size, LANE)
    NCp = _round_up(n_concepts, LANE)
    Lp = _round_up(L, LANE)

    assert batch_block % 8 == 0
    bt = min(batch_block, _round_up(B, 8))      # never collapse to bt = B_huge
    Bp = _round_up(B, bt)                       # padded/masked last tile
    grid = (Bp // bt,)

    # ---- one-time parameter padding (pre-pad once outside the step in a
    #      real training loop) --------------------------------------------
    w_enc = jnp.zeros((ENCp, NCp), jnp.bfloat16).at[:enc_size, :n_concepts].set(
        params["w_enc"].astype(jnp.bfloat16))
    # padded dictionary columns get a huge negative bias -> never in top-k
    b_enc = jnp.full((1, NCp), -1e30, f32).at[0, :n_concepts].set(
        params["b_enc"].astype(f32).reshape(-1))

    w_mulv = jnp.zeros((NCp, 2 * Lp), jnp.bfloat16)
    w_mulv = w_mulv.at[:n_concepts, :L].set(params["w_mu"].astype(jnp.bfloat16))
    w_mulv = w_mulv.at[:n_concepts, Lp:Lp + L].set(
        params["w_lv"].astype(jnp.bfloat16))
    b_mulv = jnp.zeros((1, 2 * Lp), f32)
    b_mulv = b_mulv.at[0, :L].set(params["b_mu"].astype(f32).reshape(-1))
    b_mulv = b_mulv.at[0, Lp:Lp + L].set(params["b_lv"].astype(f32).reshape(-1))

    g_mulv = jnp.ones((1, 2 * Lp), f32)
    g_mulv = g_mulv.at[0, :L].set(params["mu_bn_gamma"].astype(f32).reshape(-1))
    g_mulv = g_mulv.at[0, Lp:Lp + L].set(
        params["lv_bn_gamma"].astype(f32).reshape(-1))
    be_mulv = jnp.zeros((1, 2 * Lp), f32)
    be_mulv = be_mulv.at[0, :L].set(params["mu_bn_beta"].astype(f32).reshape(-1))
    be_mulv = be_mulv.at[0, Lp:Lp + L].set(
        params["lv_bn_beta"].astype(f32).reshape(-1))

    data_p = jnp.zeros((Bp, ENCp), f32).at[:B, :enc_size].set(data.astype(f32))
    noise_p = jnp.zeros((Bp, Lp), f32).at[:B, :L].set(noise.astype(f32))
    keep_p = jnp.zeros((Bp, Lp), f32).at[:B, :L].set(keep_mask.astype(f32))

    # ---- phase 1: encoder + top-k + fused heads (pipelined over batch) ----
    enc_kernel = functools.partial(_encode_kernel, top_k=top_k)
    mulv = pl.pallas_call(
        enc_kernel,
        out_shape=jax.ShapeDtypeStruct((Bp, 2 * Lp), f32),
        grid=grid,
        in_specs=[
            pl.BlockSpec((bt, ENCp), lambda i: (i, 0)),   # activations: tiled
            _resident_spec((ENCp, NCp)),                  # weights: resident,
            _resident_spec((1, NCp)),                     # single-buffered
            _resident_spec((NCp, 2 * Lp)),
            _resident_spec((1, 2 * Lp)),
        ],
        out_specs=pl.BlockSpec((bt, 2 * Lp), lambda i: (i, 0)),
        compiler_params=pltpu.CompilerParams(
            dimension_semantics=("parallel",),            # megacore-shardable
            vmem_limit_bytes=32 * 1024 * 1024),
    )(data_p, w_enc, b_enc, w_mulv, b_mulv)

    # ---- full-batch BatchNorm statistics (valid rows only, cheap XLA op) --
    mulv_valid = mulv[:B]
    bn_mean = jnp.mean(mulv_valid, axis=0, keepdims=True)
    bn_var = jnp.mean(jnp.square(mulv_valid - bn_mean), axis=0, keepdims=True)

    # ---- phase 2: BN / sample / KL / dropout / softmax (batch-tiled) ------
    lat_kernel = functools.partial(
        _latent_kernel, n_latent=L, n_latent_pad=Lp, prior_var=prior_var,
        prior_logvar=prior_logvar, mu_bn_eps=1e-4, lv_bn_eps=1e-3,
        dropout_p=dr)
    out_w = Lp + 128                          # [softmax | KL x 128 lanes]
    slab = pl.pallas_call(
        lat_kernel,
        out_shape=jax.ShapeDtypeStruct((Bp, out_w), f32),
        grid=grid,
        in_specs=[
            pl.BlockSpec((bt, 2 * Lp), lambda i: (i, 0)),   # mulv: tiled
            _resident_spec((1, 2 * Lp)),                    # mean
            _resident_spec((1, 2 * Lp)),                    # var
            _resident_spec((1, 2 * Lp)),                    # gamma
            _resident_spec((1, 2 * Lp)),                    # beta
            pl.BlockSpec((bt, Lp), lambda i: (i, 0)),       # gaussian eps
            pl.BlockSpec((bt, Lp), lambda i: (i, 0)),       # dropout keep mask
        ],
        out_specs=pl.BlockSpec((bt, out_w), lambda i: (i, 0)),
        compiler_params=pltpu.CompilerParams(
            dimension_semantics=("parallel",),
            vmem_limit_bytes=32 * 1024 * 1024),
    )(mulv, bn_mean, bn_var, g_mulv, be_mulv, noise_p, keep_p)

    soft = slab[:B, :L]
    kl = slab[:B, Lp]
    return soft, kl


# --------------------------------------------------------------------------
# Pure-JAX reference (same dtypes / same top-k semantics) for verification.
# --------------------------------------------------------------------------
def _reference_forward(data, params, noise, keep_mask, *, top_k, dr, alpha):
    f32 = jnp.float32
    _, L = params["w_mu"].shape
    prior_var = 1.0 / alpha - 2.0 / L + 1.0 / (L * L)
    prior_logvar = math.log(prior_var)

    pre = jnp.dot(data.astype(jnp.bfloat16),
                  params["w_enc"].astype(jnp.bfloat16),
                  preferred_element_type=f32) + params["b_enc"].reshape(1, -1)
    sparse = _topk_sparsify(pre, top_k)
    mu = jnp.dot(sparse.astype(jnp.bfloat16),
                 params["w_mu"].astype(jnp.bfloat16),
                 preferred_element_type=f32) + params["b_mu"].reshape(1, -1)
    lv = jnp.dot(sparse.astype(jnp.bfloat16),
                 params["w_lv"].astype(jnp.bfloat16),
                 preferred_element_type=f32) + params["b_lv"].reshape(1, -1)

    def bn(x, gamma, beta, eps):
        m = jnp.mean(x, axis=0, keepdims=True)
        v = jnp.mean(jnp.square(x - m), axis=0, keepdims=True)
        return (x - m) * jax.lax.rsqrt(v + eps) * gamma.reshape(1, -1) \
            + beta.reshape(1, -1)

    mu_bn = bn(mu, params["mu_bn_gamma"], params["mu_bn_beta"], 1e-4)
    lv_bn = bn(lv, params["lv_bn_gamma"], params["lv_bn_beta"], 1e-3)

    z_p = mu_bn + jnp.exp(0.5 * lv_bn) * noise
    kl = 0.5 * (jnp.sum(jnp.exp(lv) / prior_var + mu * mu / prior_var
                        + (prior_logvar - lv), axis=1) - float(L))
    z = z_p * keep_mask * (1.0 / (1.0 - dr))
    z = z - jnp.max(z, axis=1, keepdims=True)
    e = jnp.exp(z)
    return e / jnp.sum(e, axis=1, keepdims=True), kl


if __name__ == "__main__":
    # Small shapes consistent with the module. B is deliberately NOT a
    # multiple of the batch tile -> exercises the padded/masked last tile.
    B, ENC, N_CONCEPTS, N_LATENT, TOP_K = 48, 32, 64, 16, 8
    DR, ALPHA = 0.1, 1.0
    BATCH_BLOCK = 32        # -> padded batch 64, 2-step pipelined grid

    keys = jax.random.split(jax.random.PRNGKey(0), 12)
    data = jax.random.normal(keys[0], (B, ENC), jnp.float32)

    params = {
        # TopK sparse encoder (W_enc: enc_size -> dict_size)
        "w_enc": 0.1 * jax.random.normal(keys[1], (ENC, N_CONCEPTS), jnp.float32),
        "b_enc": 0.01 * jax.random.normal(keys[2], (N_CONCEPTS,), jnp.float32),
        # sparse_to_mu / sparse_to_lv (stored (in, out))
        "w_mu": 0.1 * jax.random.normal(keys[3], (N_CONCEPTS, N_LATENT), jnp.float32),
        "b_mu": 0.01 * jax.random.normal(keys[4], (N_LATENT,), jnp.float32),
        "w_lv": 0.1 * jax.random.normal(keys[5], (N_CONCEPTS, N_LATENT), jnp.float32),
        "b_lv": 0.01 * jax.random.normal(keys[6], (N_LATENT,), jnp.float32),
        # BatchNorm affine parameters (torch defaults)
        "mu_bn_gamma": jnp.ones((N_LATENT,), jnp.float32),
        "mu_bn_beta": jnp.zeros((N_LATENT,), jnp.float32),
        "lv_bn_gamma": jnp.ones((N_LATENT,), jnp.float32),
        "lv_bn_beta": jnp.zeros((N_LATENT,), jnp.float32),
    }

    # Randomness (torch: Normal.sample() and Dropout mask) drawn once here
    # and fed to the kernel as plain inputs.
    noise = jax.random.normal(keys[7], (B, N_LATENT), jnp.float32)
    keep_mask = jax.random.bernoulli(
        keys[8], 1.0 - DR, (B, N_LATENT)).astype(jnp.float32)

    soft_z, kl = concept_logistic_gaussian_forward(
        data, params, noise, keep_mask, top_k=TOP_K, dr=DR, alpha=ALPHA,
        batch_block=BATCH_BLOCK)
    soft_z, kl = jax.block_until_ready((soft_z, kl))

    # sanity: shapes, exact softmax normalization, finiteness
    assert soft_z.shape == (B, N_LATENT) and kl.shape == (B,)
    np.testing.assert_allclose(np.asarray(soft_z).sum(axis=1), np.ones(B),
                               rtol=1e-5, atol=1e-5)
    assert np.all(np.isfinite(np.asarray(kl)))

    # compare against the pure-JAX reference (same bf16 matmul dtypes)
    soft_ref, kl_ref = _reference_forward(
        data, params, noise, keep_mask, top_k=TOP_K, dr=DR, alpha=ALPHA)
    np.testing.assert_allclose(np.asarray(soft_z), np.asarray(soft_ref),
                               rtol=2e-3, atol=2e-3)
    np.testing.assert_allclose(np.asarray(kl), np.asarray(kl_ref),
                               rtol=2e-3, atol=2e-3)

    print("KERNEL_OK")
</pallas_src>

<mosaic_0001>
module attributes {stable_mosaic.version = 11 : i64} {
  func.func @_encode_kernel(%arg0: i32, %arg1: memref<32x128xf32, #tpu.memory_space<vmem>>, %arg2: memref<128x128xbf16, #tpu.memory_space<vmem>>, %arg3: memref<1x128xf32, #tpu.memory_space<vmem>>, %arg4: memref<128x256xbf16, #tpu.memory_space<vmem>>, %arg5: memref<1x256xf32, #tpu.memory_space<vmem>>, %arg6: memref<32x256xf32, #tpu.memory_space<vmem>>) attributes {dimension_semantics = [#tpu.dimension_semantics<parallel>], iteration_bounds = array<i64: 2>, scalar_prefetch = 0 : i64, scratch_operands = 0 : i64, tpu.core_type = #tpu.core_type<tc>, window_params = [{transform_indices = @transform_0, window_bounds = array<i64: 32, 128>}, {pipeline_mode = #tpu.pipeline_mode<synchronous>, transform_indices = @transform_1, window_bounds = array<i64: 128, 128>}, {pipeline_mode = #tpu.pipeline_mode<synchronous>, transform_indices = @transform_2, window_bounds = array<i64: 1, 128>}, {pipeline_mode = #tpu.pipeline_mode<synchronous>, transform_indices = @transform_3, window_bounds = array<i64: 128, 256>}, {pipeline_mode = #tpu.pipeline_mode<synchronous>, transform_indices = @transform_4, window_bounds = array<i64: 1, 256>}, {transform_indices = @transform_5, window_bounds = array<i64: 32, 256>}]} {
    %c0 = arith.constant 0 : index
    %c0_0 = arith.constant 0 : index
    %0 = vector.load %arg1[%c0, %c0_0] : memref<32x128xf32, #tpu.memory_space<vmem>>, vector<32x128xf32>
    %1 = arith.truncf %0 : vector<32x128xf32> to vector<32x128xbf16>
    %c0_1 = arith.constant 0 : index
    %c0_2 = arith.constant 0 : index
    %2 = vector.load %arg2[%c0_1, %c0_2] : memref<128x128xbf16, #tpu.memory_space<vmem>>, vector<128x128xbf16>
    %cst = arith.constant dense<0.000000e+00> : vector<32x128xf32>
    %3 = tpu.matmul %1, %2, %cst {dimension_numbers = #tpu.dot_dimension_numbers<[1], [0], [0], [1], [0, 0, 1, 1], [], []>} : vector<32x128xbf16>, vector<128x128xbf16>, vector<32x128xf32> -> vector<32x128xf32>
    %c0_3 = arith.constant 0 : index
    %c0_4 = arith.constant 0 : index
    %4 = vector.load %arg3[%c0_3, %c0_4] : memref<1x128xf32, #tpu.memory_space<vmem>>, vector<1x128xf32>
    %5 = vector.broadcast %4 : vector<1x128xf32> to vector<32x128xf32>
    %6 = arith.addf %3, %5 : vector<32x128xf32>
    %cst_5 = arith.constant dense<0xFF800000> : vector<32xf32>
    %7 = vector.multi_reduction <maximumf>, %6, %cst_5 [1] : vector<32x128xf32> to vector<32xf32>
    %8 = vector.shape_cast %7 : vector<32xf32> to vector<32x1xf32>
    %9 = vector.broadcast %8 : vector<32x1xf32> to vector<32x128xf32>
    %10 = arith.cmpf oge, %6, %9 : vector<32x128xf32>
    %cst_6 = arith.constant 0xFF800000 : f32
    %11 = vector.broadcast %cst_6 : f32 to vector<32x128xf32>
    %12 = arith.select %10, %11, %6 : vector<32x128xi1>, vector<32x128xf32>
    %cst_7 = arith.constant dense<0xFF800000> : vector<32xf32>
    %13 = vector.multi_reduction <maximumf>, %12, %cst_7 [1] : vector<32x128xf32> to vector<32xf32>
    %14 = vector.shape_cast %13 : vector<32xf32> to vector<32x1xf32>
    %15 = vector.broadcast %14 : vector<32x1xf32> to vector<32x128xf32>
    %16 = arith.cmpf oge, %12, %15 : vector<32x128xf32>
    %cst_8 = arith.constant 0xFF800000 : f32
    %17 = vector.broadcast %cst_8 : f32 to vector<32x128xf32>
    %18 = arith.select %16, %17, %12 : vector<32x128xi1>, vector<32x128xf32>
    %cst_9 = arith.constant dense<0xFF800000> : vector<32xf32>
    %19 = vector.multi_reduction <maximumf>, %18, %cst_9 [1] : vector<32x128xf32> to vector<32xf32>
    %20 = vector.shape_cast %19 : vector<32xf32> to vector<32x1xf32>
    %21 = vector.broadcast %20 : vector<32x1xf32> to vector<32x128xf32>
    %22 = arith.cmpf oge, %18, %21 : vector<32x128xf32>
    %cst_10 = arith.constant 0xFF800000 : f32
    %23 = vector.broadcast %cst_10 : f32 to vector<32x128xf32>
    %24 = arith.select %22, %23, %18 : vector<32x128xi1>, vector<32x128xf32>
    %cst_11 = arith.constant dense<0xFF800000> : vector<32xf32>
    %25 = vector.multi_reduction <maximumf>, %24, %cst_11 [1] : vector<32x128xf32> to vector<32xf32>
    %26 = vector.shape_cast %25 : vector<32xf32> to vector<32x1xf32>
    %27 = vector.broadcast %26 : vector<32x1xf32> to vector<32x128xf32>
    %28 = arith.cmpf oge, %24, %27 : vector<32x128xf32>
    %cst_12 = arith.constant 0xFF800000 : f32
    %29 = vector.broadcast %cst_12 : f32 to vector<32x128xf32>
    %30 = arith.select %28, %29, %24 : vector<32x128xi1>, vector<32x128xf32>
    %cst_13 = arith.constant dense<0xFF800000> : vector<32xf32>
    %31 = vector.multi_reduction <maximumf>, %30, %cst_13 [1] : vector<32x128xf32> to vector<32xf32>
    %32 = vector.shape_cast %31 : vector<32xf32> to vector<32x1xf32>
    %33 = vector.broadcast %32 : vector<32x1xf32> to vector<32x128xf32>
    %34 = arith.cmpf oge, %30, %33 : vector<32x128xf32>
    %cst_14 = arith.constant 0xFF800000 : f32
    %35 = vector.broadcast %cst_14 : f32 to vector<32x128xf32>
    %36 = arith.select %34, %35, %30 : vector<32x128xi1>, vector<32x128xf32>
    %cst_15 = arith.constant dense<0xFF800000> : vector<32xf32>
    %37 = vector.multi_reduction <maximumf>, %36, %cst_15 [1] : vector<32x128xf32> to vector<32xf32>
    %38 = vector.shape_cast %37 : vector<32xf32> to vector<32x1xf32>
    %39 = vector.broadcast %38 : vector<32x1xf32> to vector<32x128xf32>
    %40 = arith.cmpf oge, %36, %39 : vector<32x128xf32>
    %cst_16 = arith.constant 0xFF800000 : f32
    %41 = vector.broadcast %cst_16 : f32 to vector<32x128xf32>
    %42 = arith.select %40, %41, %36 : vector<32x128xi1>, vector<32x128xf32>
    %cst_17 = arith.constant dense<0xFF800000> : vector<32xf32>
    %43 = vector.multi_reduction <maximumf>, %42, %cst_17 [1] : vector<32x128xf32> to vector<32xf32>
    %44 = vector.shape_cast %43 : vector<32xf32> to vector<32x1xf32>
    %45 = vector.broadcast %44 : vector<32x1xf32> to vector<32x128xf32>
    %46 = arith.cmpf oge, %42, %45 : vector<32x128xf32>
    %cst_18 = arith.constant 0xFF800000 : f32
    %47 = vector.broadcast %cst_18 : f32 to vector<32x128xf32>
    %48 = arith.select %46, %47, %42 : vector<32x128xi1>, vector<32x128xf32>
    %cst_19 = arith.constant dense<0xFF800000> : vector<32xf32>
    %49 = vector.multi_reduction <maximumf>, %48, %cst_19 [1] : vector<32x128xf32> to vector<32xf32>
    %50 = vector.shape_cast %49 : vector<32xf32> to vector<32x1xf32>
    %51 = vector.broadcast %50 : vector<32x1xf32> to vector<32x128xf32>
    %52 = arith.cmpf oge, %6, %51 : vector<32x128xf32>
    %cst_20 = arith.constant 0.000000e+00 : f32
    %53 = vector.broadcast %cst_20 : f32 to vector<32x128xf32>
    %54 = arith.select %52, %6, %53 : vector<32x128xi1>, vector<32x128xf32>
    %55 = arith.truncf %54 : vector<32x128xf32> to vector<32x128xbf16>
    %c0_21 = arith.constant 0 : index
    %c0_22 = arith.constant 0 : index
    %56 = vector.load %arg4[%c0_21, %c0_22] : memref<128x256xbf16, #tpu.memory_space<vmem>>, vector<128x256xbf16>
    %cst_23 = arith.constant dense<0.000000e+00> : vector<32x256xf32>
    %57 = tpu.matmul %55, %56, %cst_23 {dimension_numbers = #tpu.dot_dimension_numbers<[1], [0], [0], [1], [0, 0, 1, 1], [], []>} : vector<32x128xbf16>, vector<128x256xbf16>, vector<32x256xf32> -> vector<32x256xf32>
    %c0_24 = arith.constant 0 : index
    %c0_25 = arith.constant 0 : index
    %58 = vector.load %arg5[%c0_24, %c0_25] : memref<1x256xf32, #tpu.memory_space<vmem>>, vector<1x256xf32>
    %59 = vector.broadcast %58 : vector<1x256xf32> to vector<32x256xf32>
    %60 = arith.addf %57, %59 : vector<32x256xf32>
    %c0_26 = arith.constant 0 : index
    %c0_27 = arith.constant 0 : index
    %61 = vector.load %arg6[%c0_26, %c0_27] : memref<32x256xf32, #tpu.memory_space<vmem>>, vector<32x256xf32>
    tpu.vector_store %arg6[%c0_26, %c0_27], %60 {strides = array<i32>} : memref<32x256xf32, #tpu.memory_space<vmem>>, vector<32x256xf32>,
    return
  }
  func.func @transform_0(%arg0: i32) -> (i32, i32) {
    %c0_i32 = arith.constant 0 : i32
    %c0_i32_0 = arith.constant 0 : i32
    return %arg0, %c0_i32 : i32, i32
  }
  func.func @transform_1(%arg0: i32) -> (i32, i32) {
    %c0_i32 = arith.constant 0 : i32
    %c0_i32_0 = arith.constant 0 : i32
    %c0_i32_1 = arith.constant 0 : i32
    return %c0_i32, %c0_i32_0 : i32, i32
  }
  func.func @transform_2(%arg0: i32) -> (i32, i32) {
    %c0_i32 = arith.constant 0 : i32
    %c0_i32_0 = arith.constant 0 : i32
    %c0_i32_1 = arith.constant 0 : i32
    return %c0_i32, %c0_i32_0 : i32, i32
  }
  func.func @transform_3(%arg0: i32) -> (i32, i32) {
    %c0_i32 = arith.constant 0 : i32
    %c0_i32_0 = arith.constant 0 : i32
    %c0_i32_1 = arith.constant 0 : i32
    return %c0_i32, %c0_i32_0 : i32, i32
  }
  func.func @transform_4(%arg0: i32) -> (i32, i32) {
    %c0_i32 = arith.constant 0 : i32
    %c0_i32_0 = arith.constant 0 : i32
    %c0_i32_1 = arith.constant 0 : i32
    return %c0_i32, %c0_i32_0 : i32, i32
  }
  func.func @transform_5(%arg0: i32) -> (i32, i32) {
    %c0_i32 = arith.constant 0 : i32
    %c0_i32_0 = arith.constant 0 : i32
    return %arg0, %c0_i32 : i32, i32
  }
}

</mosaic_0001>

<bundles_post_ra>
// kernel: tpu_custom_call.1
= control target key start
LH: loop header
LB: loop body
LE: loop exit
PB: predicated region body
PF: predicated region fallthrough
CT: control target
= control target key end

     0   :  { %10 = vsyncpa [#allocation3], 0  ;;  %s1476_s0 = inlined_call_operand.hbm [shape: f32[64,128], index: 0, kind: input, shape index: {}]   ;;  %s1477_s1 = inlined_call_operand.hbm [shape: bf16[128,128], index: 1, kind: input, shape index: {}]   ;;  %s1478_s2 = inlined_call_operand.vmem [shape: f32[1,128], index: 2, kind: input, shape index: {}]   ;;  %s1479_s3 = inlined_call_operand.hbm [shape: bf16[128,256], index: 3, kind: input, shape index: {}]   ;;  %s1480_s4 = inlined_call_operand.vmem [shape: f32[1,256], index: 4, kind: input, shape index: {}]   ;;  %s1481_s5 = inlined_call_operand.hbm [shape: f32[64,256], index: 5, kind: output, shape index: {}]  }
   0x1   :  { %12 = vsyncpa [#allocation3 + $0x1], 0 }
   0x2   :  { %13 = vsyncpa [#allocation6], 0 }
   0x3   :  { %14 = vsyncpa [#allocation4], 0 }
   0x4   :  { %16 = vsyncpa [#allocation4 + $0x1], 0  ;;  %s1195_s18 = smov 0   ;;  %s1197_s19 = smov 0  }
   0x5   :  { %s1199_s20 = smov 0   ;;  %s1201_s21 = smov 0  }
   0x6 LB: > { %s1216_s22 = sadd.s32 4294967295, %s1152_s21   ;;  %s807_s23 = sadd.s32 4294967294, %s1152_s21   ;;  %s1152_s21 = sphi %s1201_s21, %s1501_s21   ;;  %s1148_s20 = sphi %s1199_s20, %s1500_s20   ;;  %s1144_s19 = sphi %s1197_s19, %s1499_s19   ;;  %s1140_s18 = sphi %s1195_s18, %s1498_s18  }
   0x7   : > { %p42_p0 = scmp.ne.s32.totalorder %s1144_s19, %s1140_s18  ;;  %p1482_p1 = scmp.eq.s32.totalorder %s1216_s22, 0 }
   0x8   : > { %p156_p3 = scmp.eq.s32.totalorder %s807_s23, 1  ;;  %p808_p5 = scmp.ge.s32.totalorder %s1152_s21, 1 }
   0x9   : > { %p1225_p4 = por %p1482_p1, %p42_p0  ;;  %p163_p7 = scmp.lt.s32.totalorder %s1152_s21, 3 }
   0xa   : > { %p1230_p6 = por %p156_p3, %p42_p0  ;;  %s1154_s27 = smov [#allocation5]  }
   0xb   : > { %s1485_s24 = scalar_select %p1225_p4, 1, 0 }
   0xc   : > { %s1486_s25 = scalar_select %p1230_p6, 1, 0 }
   0xd   : > { %p1235_p8 = pnand %p808_p5, %p163_p7  ;;  %s175_s28 = sshll.u32 %s1154_s27, 4  ;;  %s1239_s28 = int_to_ptr.vmem [resolvable:$true] %s175_s28 }
   0xe   : > { %s1155_s30 = smov [#allocation7]   ;;  %s996_s9 = scalar_lea.hbm %s1477_s1, 1024 }
   0xf   : > { %p902_p9 = pneg %p1235_p8  ;;  %s191_s6 = sshll.u32 %s1155_s30, 4  ;;  %s1250_s6 = int_to_ptr.vmem [resolvable:$true] %s191_s6 }
  0x10   : > { %p997_p12 = scmp.ne.s32.totalorder %s1477_s1, %s996_s9  ;;  %p1003_p5 = scmp.lt.u32.totalorder %s996_s9, %s1477_s1 }
  0x11   : > { %p1246_p11 = pnand %p902_p9, %p1482_p1 }
  0x13   : > { %p998_p13 = pneg %p1246_p11 }
  0x15   : > { %p999_p0 = pnand %p998_p13, %p997_p12 }
  0x17   : > { %p1000_p3 = pneg %p999_p0 }
  0x19   : > { %p1005_p7 = pnand %p1003_p5, %p1000_p3 }
  0x1b   : > { %1008 = shalt.err (!%p1005_p7)
}
  0x1c   : > { %s1009_s14 = scalar_lea.vmem %s1239_s28, 1024  ;;  %p1017_p2 = scmp.lt.s32.totalorder %s1239_s28, %s1239_s28 }
  0x1d   : > { %p1010_p9 = scmp.ne.s32.totalorder %s1239_s28, %s1009_s14  ;;  %p1018_p12 = scmp.lt.s32.totalorder %s1009_s14, %s1009_s14 }
  0x1f   : > { %p1012_p10 = pnand %p1010_p9, %p998_p13  ;;  %p1019_p0 = por %p1018_p12, %p1017_p2 }
  0x21   : > { %p1013_p1 = pneg %p1012_p10 }
  0x23   : > { %p1020_p6 = pnand %p1019_p0, %p1013_p1 }
  0x25   : > { %1023 = shalt.err (!%p1020_p6)
}
  0x26   : > { %s1156_s15 = smov 64   ;;  %s1157_s16 = smov 4  }
  0x27   : > { %905 = dma.hbm_to_vmem [thread:$0]  (!%p1246_p11), %s1477_s1, 1024, %s1239_s28, [#allocation6], %s1156_s15, %s1156_s15, %s1157_s16  }
  0x28   : > { %s1024_s7 = scalar_lea.hbm %s1479_s3, 2048 }
  0x29   : > { %p1025_p2 = scmp.ne.s32.totalorder %s1479_s3, %s1024_s7  ;;  %p1031_p10 = scmp.lt.u32.totalorder %s1024_s7, %s1479_s3 }
  0x2b   : > { %p1027_p1 = pnand %p1025_p2, %p998_p13 }
  0x2d   : > { %p1028_p6 = pneg %p1027_p1 }
  0x2f   : > { %p1033_p3 = pnand %p1031_p10, %p1028_p6 }
  0x31   : > { %1036 = shalt.err (!%p1033_p3)
}
  0x32   : > { %s1037_s28 = scalar_lea.vmem %s1250_s6, 2048  ;;  %p1045_p12 = scmp.lt.s32.totalorder %s1250_s6, %s1250_s6 }
  0x33   : > { %p1038_p5 = scmp.ne.s32.totalorder %s1250_s6, %s1037_s28  ;;  %p1046_p0 = scmp.lt.s32.totalorder %s1037_s28, %s1037_s28 }
  0x35   : > { %p1040_p7 = pnand %p1038_p5, %p998_p13  ;;  %p1047_p2 = por %p1046_p0, %p1045_p12 }
  0x37   : > { %p1041_p9 = pneg %p1040_p7 }
  0x39   : > { %p1048_p1 = pnand %p1047_p2, %p1041_p9 }
  0x3b   : > { %1051 = shalt.err (!%p1048_p1)
}
  0x3c   : > { %s1158_s12 = smov 128   ;;  %s1159_s13 = smov 8  }
  0x3d   : > { %908 = dma.hbm_to_vmem [thread:$0]  (!%p1246_p11), %s1479_s3, 2048, %s1250_s6, [#allocation6], %s1158_s12, %s1158_s12, %s1159_s13  }
  0x3e   : > { %s1308_s16 = sadd.s32 1, %s1152_s21   ;;  %s29_s23 = sadd.s32 1, %s1148_s20 }
  0x3f   : > { %s26_s17 = ssub.s32 %s1152_s21, %s1308_s16  ;;  %p36_p6 = scmp.ne.s32.totalorder %s1148_s20, %s1144_s19 }
  0x40   : > { %p27_p13 = scmp.eq.s32.totalorder %s26_s17, 0  ;;  %p37_p10 = scmp.eq.s32.totalorder %s1152_s21, 0 }
  0x41   : > { %p1489_p5 = scmp.eq.s32.totalorder %s1216_s22, 1  ;;  %p919_p9 = scmp.lt.s32.totalorder %s1152_s21, 2 }
  0x42   : > { %s1317_s27 = scalar_select %p27_p13, %s1148_s20, %s29_s23  }
  0x43   : > { %p38_p3 = por %p37_p10, %p36_p6  ;;  %p1321_p7 = por %p1489_p5, %p36_p6 }
  0x44   : > { %s208_s30 = sand.u32 1, %s1148_s20   ;;  %s857_s6 = sshll.u32 %s1152_s21, 9 }
  0x45   : > { %s1490_s29 = scalar_select %p1321_p7, 1, 0 }
  0x46   : > { %s812_s7 = sshll.u32 %s208_s30, 5  ;;  %s1331_s10 = scalar_lea.hbm %s1476_s0, %s857_s6 }
  0x47   : > { %s212_s11 = scalar_lea.vmem [#allocation2], %s812_s7  ;;  %p1335_p11 = pnand %p919_p9, %p38_p3 }
  0x48   : > { %s219_s28 = sshll.u32 %s212_s11, 4  ;;  %s1339_s15 = scalar_lea.sflag [#allocation3], %s208_s30  ;;  %s1333_s28 = int_to_ptr.vmem [resolvable:$true] %s219_s28 }
  0x49   : > { %s1052_s17 = scalar_lea.hbm %s1331_s10, 512  ;;  %p1054_p0 = pneg %p1335_p11 }
  0x4a   : > { %p1053_p12 = scmp.ne.s32.totalorder %s1331_s10, %s1052_s17  ;;  %s1057_s6 = scalar_lea.hbm %s1476_s0, 1024 }
  0x4b   : > { %p1058_p13 = scmp.lt.u32.totalorder %s1331_s10, %s1476_s0  ;;  %p1059_p6 = scmp.lt.u32.totalorder %s1057_s6, %s1052_s17 }
  0x4c   : > { %p1055_p2 = pnand %p1054_p0, %p1053_p12  ;;  %p1061_p3 = scmp.lt.u32.totalorder %s1052_s17, %s1331_s10 }
  0x4d   : > { %p1060_p10 = por %p1059_p6, %p1058_p13 }
  0x4e   : > { %p1056_p1 = pneg %p1055_p2 }
  0x4f   : > { %p1062_p5 = por %p1061_p3, %p1060_p10 }
  0x51   : > { %p1063_p9 = pnand %p1062_p5, %p1056_p1 }
  0x53   : > { %1066 = shalt.err (!%p1063_p9)
}
  0x54   : > { %s1067_s30 = scalar_lea.vmem %s1333_s28, 512  ;;  %s1160_s11 = smov [#allocation2]  }
  0x55   : > { %p1068_p12 = scmp.ne.s32.totalorder %s1333_s28, %s1067_s30  ;;  %s1072_s23 = sshll.u32 %s1160_s11, 4  ;;  %s1073_s23 = int_to_ptr.vmem [resolvable:$false] %s1072_s23 }
  0x56   : > { %s1074_s7 = scalar_lea.vmem %s1073_s23, 1024  ;;  %p1075_p4 = scmp.lt.s32.totalorder %s1333_s28, %s1073_s23 }
  0x57   : > { %p1070_p2 = pnand %p1068_p12, %p1054_p0  ;;  %p1076_p13 = scmp.lt.s32.totalorder %s1074_s7, %s1067_s30 }
  0x59   : > { %p1071_p7 = pneg %p1070_p2  ;;  %p1077_p6 = por %p1076_p13, %p1075_p4 }
  0x5b   : > { %p1078_p10 = pnand %p1077_p6, %p1071_p7 }
  0x5d   : > { %1081 = shalt.err (!%p1078_p10)
}
  0x5e   : > { %912 = dma.hbm_to_vmem [thread:$0]  (!%p1335_p11), %s1331_s10, 512, %s1333_s28, %s1339_s15, %s1158_s12, %s1158_s12, %s1159_s13  }
  0x5f   : > { %231 = sbr.rel (%p1235_p8) target bundleno = 1750 (0x6d6), region = 40  ;;  %s1373_s17 = sand.u32 (!%p1235_p8), 1, %s1144_s19  }
  0x60   : > { %s816_s6 = sshll.u32 (!%p1235_p8), %s1373_s17, 5  ;;  %s234_s8 = scalar_lea.sflag (!%p1235_p8), [#allocation3], %s1373_s17 }
  0x61   : > { %s1377_s9 = scalar_lea.vmem (!%p1235_p8), [#allocation2], %s816_s6  ;;  %p1492_p4 = scmp.ne.s32.totalorder (!%p1235_p8), %s1485_s24, 0 }
  0x66   : > { %1127 = dma.done.wait (%p1492_p4), %s234_s8, 512  }
  0x67   : > { %1129 = vsyncadd (%p1492_p4), %s234_s8, 4294966784  ;;  %p1493_p7 = scmp.eq.s32.totalorder %s1216_s22, 0 }
  0x69   : > { %1131 = dma.done.wait (%p1493_p7), [#allocation6], 3072   ;;  %p1494_p8 = pmov %p1493_p7 }
  0x6a   : > { %v964_v0 = vld [vmem:[#allocation5] sm:$0xff]   ;;  %v965_v1 = vld [vmem:[#allocation5 + $0x8] sm:$0xff]   ;;  %v966_v2 = vld [vmem:[#allocation5 + $0x10] sm:$0xff]   ;;  %s819_s10 = sshll.u32 %s1373_s17, 6  ;;  %s859_s15 = sshll.u32 %s1216_s22, 10 }
  0x6b   : > { %1133 = vsyncadd (%p1494_p8), [#allocation6], 4294964224  ;;  %870 = vmatprep.subr.bf16.mxu0 %v964_v0  ;;  %v967_v3 = vld [vmem:[#allocation5 + $0x18] sm:$0xff]   ;;  %v275_v4 = vld [vmem:[%s1377_s9] sm:$0xff]  ;;  %s271_s28 = scalar_lea.vmem [#allocation8], %s819_s10  ;;  %s1432_s23 = scalar_lea.hbm %s1481_s5, %s859_s15 }
  0x6c   : > { %871 = vmatpush3.bf16.msra.mxu0 %v964_v0  ;;  %v276_v5 = vld [vmem:[%s1377_s9 + $0x8] sm:$0xff]  ;;  %v968_v7 = vld [vmem:[#allocation5 + $0x20] sm:$0xff]   ;;  %v970_v9 = vld [vmem:[#allocation5 + $0x30] sm:$0xff]   ;;  %s715_s14 = sshll.u32 %s271_s28, 4  ;;  %s701_s22 = scalar_lea.sflag [#allocation4], %s1373_s17  ;;  %s1427_s14 = int_to_ptr.vmem [resolvable:$true] %s715_s14 }
  0x6d   : > { %872 = vmatprep.subr.bf16.mxu0 %v965_v1  ;;  %v279_v6 = vpack.c.bf16 %v276_v5, %v275_v4  ;;  %v969_v8 = vld [vmem:[#allocation5 + $0x28] sm:$0xff]   ;;  %v971_v10 = vld [vmem:[#allocation5 + $0x38] sm:$0xff]   ;;  %v277_v11 = vld [vmem:[%s1377_s9 + $0x10] sm:$0xff]  ;;  %s1082_s7 = scalar_lea.vmem %s1427_s14, 1024  ;;  %p1495_p0 = scmp.ne.s32.totalorder %s1490_s29, 0 }
  0x6e   : > { %v278_v12 = vld [vmem:[%s1377_s9 + $0x18] sm:$0xff]  ;;  %v820_v14 = vld [vmem:[%s1478_s2] ss:$0 sm:$0xff]  ;;  %p1083_p11 = scmp.ne.s32.totalorder %s1427_s14, %s1082_s7  ;;  %s1162_s6 = smov [#allocation8]  }
  0x6f   : > { %886 = vmatprep.mubr.bf16.mxu0 %v279_v6  ;;  %v280_v13 = vpack.c.bf16 %v278_v12, %v277_v11  ;;  %v978_v11 = vld [vmem:[#allocation7 + $0x24] ss:$8 sps:$4 sm:$0xff]   ;;  %v980_v12 = vld [vmem:[#allocation7 + $0x20] ss:$8 sps:$4 sm:$0xff]   ;;  %s1086_s8 = sshll.u32 %s1162_s6, 4  ;;  %s1087_s8 = int_to_ptr.vmem [resolvable:$false] %s1086_s8 }
  0x70   : > { %873 = vmatpush3.bf16.msra.mxu0 %v965_v1  ;;  %p1084_p1 = pnand %p1083_p11, %p1495_p0  ;;  %s1088_s9 = scalar_lea.vmem %s1087_s8, 2048 }
  0x71   : > { %874 = vmatprep.subr.bf16.mxu0 %v966_v2  ;;  %p1089_p5 = scmp.lt.s32.totalorder %s1427_s14, %s1087_s8  ;;  %p1090_p9 = scmp.lt.s32.totalorder %s1088_s9, %s1082_s7 }
  0x72   : > { %p1085_p3 = pneg %p1084_p1 }
  0x73   : > { %p1091_p12 = por %p1090_p9, %p1089_p5 }
  0x74   : > { %875 = vmatpush3.bf16.msra.mxu0 %v966_v2 }
  0x75   : > { %876 = vmatprep.subr.bf16.mxu0 %v967_v3  ;;  %p1092_p2 = pnand %p1091_p12, %p1085_p3 }
  0x78   : > { %877 = vmatpush3.bf16.msra.mxu0 %v967_v3 }
  0x79   : > { %878 = vmatprep.subr.bf16.mxu0 %v968_v7 }
  0x7c   : > { %879 = vmatpush3.bf16.msra.mxu0 %v968_v7  ;;  %v972_v7 = vld [vmem:[#allocation7 + $0x4] ss:$8 sps:$4 sm:$0xff]  }
  0x7d   : > { %880 = vmatprep.subr.bf16.mxu0 %v969_v8  ;;  %639 = vmatprep.subr.bf16.mxu1 %v972_v7 }
  0x80   : > { %881 = vmatpush3.bf16.msra.mxu0 %v969_v8  ;;  %v974_v8 = vld [vmem:[#allocation7] ss:$8 sps:$4 sm:$0xff]  }
  0x81   : > { %882 = vmatprep.subr.bf16.mxu0 %v970_v9  ;;  %640 = vmatpush1.bf16.msra.mxu1 %v974_v8 }
  0x84   : > { %883 = vmatpush3.bf16.msra.mxu0 %v970_v9  ;;  %v975_v9 = vld [vmem:[#allocation7 + $0x14] ss:$8 sps:$4 sm:$0xff]  }
  0x85   : > { %884 = vmatprep.subr.bf16.mxu0 %v971_v10  ;;  %641 = vmatprep.subr.bf16.mxu1 %v975_v9 }
  0x88   : > { %885 = vmatpush3.bf16.msra.mxu0 %v971_v10  ;;  %v977_v10 = vld [vmem:[#allocation7 + $0x10] ss:$8 sps:$4 sm:$0xff]  }
  0x89   : > { %642 = vmatpush1.bf16.msra.mxu1 %v977_v10 }
  0x8a   : > { %643 = vmatprep.subr.bf16.mxu1 %v978_v11 }
  0x8b   : > { %887 = vmatmul.mubr.bf16.vlgmr.msra.gmra.mrb[0].mxu0 %v280_v13  ;;  %v981_v13 = vld [vmem:[#allocation7 + $0x34] ss:$8 sps:$4 sm:$0xff]  }
  0x8d   : > { %644 = vmatpush1.bf16.msra.mxu1 %v980_v12 }
  0x8e   : > { %645 = vmatprep.subr.bf16.mxu1 %v981_v13 }
 0x15e   : > { %v888_v15 = vpop.f32.mrb[0].mxu0 }
 0x15f   : > { %v1394_v16 = vadd.f32 %v888_v15, %v820_v14  ;;  %v386_v17 = vpop.f32.mrb[1].mxu0  ;;  %v984_v15 = vld [vmem:[#allocation7 + $0x44] ss:$8 sps:$4 sm:$0xff]  }
 0x160   : > { %v1396_v18 = vadd.f32 %v820_v14, %v386_v17  ;;  %v889_v19 = vpop.f32.mrb[2].mxu0  ;;  %v986_v17 = vld [vmem:[#allocation7 + $0x40] ss:$8 sps:$4 sm:$0xff]  }
 0x161   : > { %405 = vmax.xlane.f32.xlu1 %v1394_v16  ;;  %v389_v20 = vpop.f32.mrb[3].mxu0  ;;  %v1400_v21 = vadd.f32 %v889_v19, %v820_v14  ;;  %v987_v19 = vld [vmem:[#allocation7 + $0x54] ss:$8 sps:$4 sm:$0xff]  }
 0x162   : > { %401 = vmax.xlane.f32.xlu0 %v1396_v18  ;;  %v1402_v22 = vadd.f32 %v820_v14, %v389_v20  ;;  %v983_v14 = vld [vmem:[#allocation7 + $0x30] ss:$8 sps:$4 sm:$0xff]  }
 0x163   : > { %646 = vmatpush1.bf16.msra.mxu1 %v983_v14  ;;  %v989_v20 = vld [vmem:[#allocation7 + $0x50] ss:$8 sps:$4 sm:$0xff]  }
 0x164   : > { %647 = vmatprep.subr.bf16.mxu1 %v984_v15 }
 0x165   : > { %407 = vmax.xlane.f32.xlu1 %v1400_v21 }
 0x166   : > { %403 = vmax.xlane.f32.xlu0 %v1402_v22 }
 0x167   : > { %648 = vmatpush1.bf16.msra.mxu1 %v986_v17 }
 0x168   : > { %649 = vmatprep.subr.bf16.mxu1 %v987_v19 }
 0x16b   : > { %650 = vmatpush1.bf16.msra.mxu1 %v989_v20 }
 0x1ee   : > { %v406_v23 = vpop.xlane.xlu1 %405 }
 0x1ef   : > { %v402_v24 = vpop.xlane.xlu0 %401  ;;  %vm411_vm1 = vcmp.ge.f32.partialorder %v1394_v16, %v406_v23  ;;  %v990_v23 = vld [vmem:[#allocation7 + $0x64] ss:$8 sps:$4 sm:$0xff]  }
 0x1f0   : > { %vm409_vm0 = vcmp.ge.f32.partialorder %v1396_v18, %v402_v24  ;;  %v415_v28 = vsel %vm411_vm1, -inf, %v1394_v16  ;;  %v992_v24 = vld [vmem:[#allocation7 + $0x60] ss:$8 sps:$4 sm:$0xff]   ;;  %651 = vmatprep.subr.bf16.mxu1 %v990_v23 }
 0x1f1   : > { %v413_v25 = vsel %vm409_vm0, -inf, %v1396_v18  ;;  %652 = vmatpush1.bf16.msra.mxu1 %v992_v24 }
 0x1f2   : > { %417 = vmax.xlane.f32.xlu0 %v413_v25  ;;  %v408_v26 = vpop.xlane.xlu1 %407 }
 0x1f3   : > { %v404_v27 = vpop.xlane.xlu0 %403  ;;  %vm412_vm3 = vcmp.ge.f32.partialorder %v1400_v21, %v408_v26 }
 0x1f4   : > { %vm410_vm2 = vcmp.ge.f32.partialorder %v1402_v22, %v404_v27  ;;  %v416_v30 = vsel %vm412_vm3, -inf, %v1400_v21 }
 0x1f5   : > { %v414_v29 = vsel %vm410_vm2, -inf, %v1402_v22 }
 0x1f6   : > { %421 = vmax.xlane.f32.xlu0 %v415_v28  ;;  %419 = vmax.xlane.f32.xlu1 %v414_v29 }
 0x1fa   : > { %423 = vmax.xlane.f32.xlu1 %v416_v30 }
 0x27f   : > { %v418_v31 = vpop.xlane.xlu0 %417 }
 0x280   : > { %vm425_vm4 = vcmp.ge.f32.partialorder %v413_v25, %v418_v31 }
 0x281   : > { %v429_v32 = vsel %vm425_vm4, -inf, %v413_v25 }
 0x282   : > { %433 = vmax.xlane.f32.xlu0 %v429_v32 }
 0x283   : > { %v420_v33 = vpop.xlane.xlu1 %419  ;;  %v422_v34 = vpop.xlane.xlu0 %421 }
 0x284   : > { %vm426_vm5 = vcmp.ge.f32.partialorder %v414_v29, %v420_v33  ;;  %vm427_vm6 = vcmp.ge.f32.partialorder %v415_v28, %v422_v34  ;;  %v993_v33 = vld [vmem:[#allocation7 + $0x74] ss:$8 sps:$4 sm:$0xff]   ;;  %v995_v34 = vld [vmem:[#allocation7 + $0x70] ss:$8 sps:$4 sm:$0xff]  }
 0x285   : > { %v430_v35 = vsel %vm426_vm5, -inf, %v414_v29  ;;  %v431_v36 = vsel %vm427_vm6, -inf, %v415_v28  ;;  %653 = vmatprep.subr.bf16.mxu1 %v993_v33 }
 0x286   : > { %435 = vmax.xlane.f32.xlu1 %v430_v35  ;;  %437 = vmax.xlane.f32.xlu0 %v431_v36 }
 0x287   : > { %v424_v37 = vpop.xlane.xlu1 %423  ;;  %654 = vmatpush1.bf16.msra.mxu1 %v995_v34 }
 0x288   : > { %vm428_vm7 = vcmp.ge.f32.partialorder %v416_v30, %v424_v37 }
 0x289   : > { %v432_v38 = vsel %vm428_vm7, -inf, %v416_v30 }
 0x28a   : > { %439 = vmax.xlane.f32.xlu1 %v432_v38 }
 0x30f   : > { %v434_v39 = vpop.xlane.xlu0 %433 }
 0x310   : > { %vm441_vm8 = vcmp.ge.f32.partialorder %v429_v32, %v434_v39 }
 0x311   : > { %v445_v40 = vsel %vm441_vm8, -inf, %v429_v32 }
 0x312   : > { %449 = vmax.xlane.f32.xlu0 %v445_v40 }
 0x313   : > { %v436_v41 = vpop.xlane.xlu1 %435  ;;  %v438_v42 = vpop.xlane.xlu0 %437 }
 0x314   : > { %vm442_vm9 = vcmp.ge.f32.partialorder %v430_v35, %v436_v41  ;;  %vm443_vm10 = vcmp.ge.f32.partialorder %v431_v36, %v438_v42  ;;  %v849_v41 = vpack.c.bf16 %v1400_v21, %v1394_v16  ;;  %v549_v42 = vlaneseq }
 0x315   : > { %v446_v43 = vsel %vm442_vm9, -inf, %v430_v35  ;;  %v447_v44 = vsel %vm443_vm10, -inf, %v431_v36  ;;  %v1161_v35 = vmov 0  }
 0x316   : > { %451 = vmax.xlane.f32.xlu1 %v446_v43  ;;  %453 = vmax.xlane.f32.xlu0 %v447_v44 }
 0x317   : > { %v440_v45 = vpop.xlane.xlu1 %439  ;;  %671 = vmatprep.mubr.bf16.mxu1 %v1161_v35 }
 0x318   : > { %vm444_vm11 = vcmp.ge.f32.partialorder %v432_v38, %v440_v45 }
 0x319   : > { %v448_v46 = vsel %vm444_vm11, -inf, %v432_v38  ;;  %v846_v38 = vpack.c.bf16 %v1402_v22, %v1396_v18 }
 0x31a   : > { %455 = vmax.xlane.f32.xlu1 %v448_v46 }
 0x39f   : > { %v450_v47 = vpop.xlane.xlu0 %449 }
 0x3a0   : > { %vm457_vm12 = vcmp.ge.f32.partialorder %v445_v40, %v450_v47 }
 0x3a1   : > { %v461_v48 = vsel %vm457_vm12, -inf, %v445_v40 }
 0x3a2   : > { %465 = vmax.xlane.f32.xlu0 %v461_v48 }
 0x3a3   : > { %v452_v49 = vpop.xlane.xlu1 %451  ;;  %v454_v50 = vpop.xlane.xlu0 %453 }
 0x3a4   : > { %vm458_vm13 = vcmp.ge.f32.partialorder %v446_v43, %v452_v49  ;;  %vm459_vm14 = vcmp.ge.f32.partialorder %v447_v44, %v454_v50 }
 0x3a5   : > { %v462_v51 = vsel %vm458_vm13, -inf, %v446_v43  ;;  %v463_v52 = vsel %vm459_vm14, -inf, %v447_v44  ;;  %v550_v43 = vshrl.u32 %v549_v42, 7 }
 0x3a6   : > { %467 = vmax.xlane.f32.xlu1 %v462_v51  ;;  %469 = vmax.xlane.f32.xlu0 %v463_v52 }
 0x3a7   : > { %v456_v53 = vpop.xlane.xlu1 %455  ;;  %v551_v44 = vsub.s32 0, %v550_v43 }
 0x3a8   : > { %vm460_vm15 = vcmp.ge.f32.partialorder %v448_v46, %v456_v53 }
 0x3a9   : > { %v464_v54 = vsel %vm460_vm15, -inf, %v448_v46 }
 0x3aa   : > { %471 = vmax.xlane.f32.xlu1 %v464_v54 }
 0x42f   : > { %v466_v55 = vpop.xlane.xlu0 %465 }
 0x430   : > { %vm473_vm0 = vcmp.ge.f32.partialorder %v461_v48, %v466_v55 }
 0x431   : > { %v477_v56 = vsel %vm473_vm0, -inf, %v461_v48 }
 0x432   : > { %481 = vmax.xlane.f32.xlu0 %v477_v56 }
 0x433   : > { %v468_v57 = vpop.xlane.xlu1 %467  ;;  %v470_v58 = vpop.xlane.xlu0 %469 }
 0x434   : > { %vm474_vm1 = vcmp.ge.f32.partialorder %v462_v51, %v468_v57  ;;  %vm475_vm2 = vcmp.ge.f32.partialorder %v463_v52, %v470_v58 }
 0x435   : > { %v478_v59 = vsel %vm474_vm1, -inf, %v462_v51  ;;  %v479_v60 = vsel %vm475_vm2, -inf, %v463_v52 }
 0x436   : > { %483 = vmax.xlane.f32.xlu1 %v478_v59  ;;  %485 = vmax.xlane.f32.xlu0 %v479_v60 }
 0x437   : > { %v472_v61 = vpop.xlane.xlu1 %471 }
 0x438   : > { %vm476_vm3 = vcmp.ge.f32.partialorder %v464_v54, %v472_v61 }
 0x439   : > { %v480_v62 = vsel %vm476_vm3, -inf, %v464_v54 }
 0x43a   : > { %487 = vmax.xlane.f32.xlu1 %v480_v62 }
 0x4bf   : > { %v482_v63 = vpop.xlane.xlu0 %481 }
 0x4c0   : > { %vm489_vm4 = vcmp.ge.f32.partialorder %v477_v56, %v482_v63 }
 0x4c1   : > { %v493_v0 = vsel %vm489_vm4, -inf, %v477_v56 }
 0x4c2   : > { %497 = vmax.xlane.f32.xlu0 %v493_v0 }
 0x4c3   : > { %v484_v1 = vpop.xlane.xlu1 %483  ;;  %v486_v2 = vpop.xlane.xlu0 %485 }
 0x4c4   : > { %vm490_vm5 = vcmp.ge.f32.partialorder %v478_v59, %v484_v1  ;;  %vm491_vm6 = vcmp.ge.f32.partialorder %v479_v60, %v486_v2 }
 0x4c5   : > { %v494_v3 = vsel %vm490_vm5, -inf, %v478_v59  ;;  %v495_v4 = vsel %vm491_vm6, -inf, %v479_v60 }
 0x4c6   : > { %499 = vmax.xlane.f32.xlu1 %v494_v3  ;;  %501 = vmax.xlane.f32.xlu0 %v495_v4 }
 0x4c7   : > { %v488_v5 = vpop.xlane.xlu1 %487 }
 0x4c8   : > { %vm492_vm7 = vcmp.ge.f32.partialorder %v480_v62, %v488_v5 }
 0x4c9   : > { %v496_v6 = vsel %vm492_vm7, -inf, %v480_v62 }
 0x4ca   : > { %503 = vmax.xlane.f32.xlu1 %v496_v6 }
 0x54f   : > { %v498_v25 = vpop.xlane.xlu0 %497 }
 0x550   : > { %vm505_vm8 = vcmp.ge.f32.partialorder %v493_v0, %v498_v25 }
 0x551   : > { %v509_v26 = vsel %vm505_vm8, -inf, %v493_v0 }
 0x552   : > { %513 = vmax.xlane.f32.xlu0 %v509_v26 }
 0x553   : > { %v500_v27 = vpop.xlane.xlu1 %499  ;;  %v502_v28 = vpop.xlane.xlu0 %501 }
 0x554   : > { %vm506_vm9 = vcmp.ge.f32.partialorder %v494_v3, %v500_v27  ;;  %vm507_vm10 = vcmp.ge.f32.partialorder %v495_v4, %v502_v28 }
 0x555   : > { %v510_v29 = vsel %vm506_vm9, -inf, %v494_v3  ;;  %v511_v30 = vsel %vm507_vm10, -inf, %v495_v4 }
 0x556   : > { %515 = vmax.xlane.f32.xlu1 %v510_v29  ;;  %517 = vmax.xlane.f32.xlu0 %v511_v30 }
 0x557   : > { %v504_v31 = vpop.xlane.xlu1 %503 }
 0x558   : > { %vm508_vm11 = vcmp.ge.f32.partialorder %v496_v6, %v504_v31 }
 0x559   : > { %v512_v32 = vsel %vm508_vm11, -inf, %v496_v6 }
 0x55a   : > { %519 = vmax.xlane.f32.xlu1 %v512_v32 }
 0x5df   : > { %v514_v36 = vpop.xlane.xlu0 %513 }
 0x5e0   : > { %vm521_vm12 = vcmp.ge.f32.partialorder %v1396_v18, %v514_v36  ;;  %v547_v18 = vld [vmem:[%s1480_s4] sm:$0x3] }
 0x5e1   : > { %v552_v45 = vrot.slane %v547_v18, %v551_v44 }
 0x5e3   : > { %v516_v37 = vpop.xlane.xlu1 %515  ;;  %v518_v40 = vpop.xlane.xlu0 %517 }
 0x5e4   : > { %vm522_vm13 = vcmp.ge.f32.partialorder %v1402_v22, %v516_v37  ;;  %vm523_vm0 = vcmp.ge.f32.partialorder %v1394_v16, %v518_v40  ;;  %v555_v22 = vsub.s32 1, %v550_v43 }
 0x5e5   : > { %vm845_vm14 = vmpackc.low %vm522_vm13, %vm521_vm12 }
 0x5e6   : > { %847 = vmatmul.mubr.msk.bf16.vlgmr.msra.gmra.mrb[0].mxu1 %vm845_vm14, %v846_v38  ;;  %v556_v46 = vrot.slane %v547_v18, %v555_v22 }
 0x5e7   : > { %v520_v39 = vpop.xlane.xlu1 %519  ;;  %681 = vmatprep.mubr.bf16.mxu1 %v1161_v35 }
 0x5e8   : > { %vm524_vm15 = vcmp.ge.f32.partialorder %v1400_v21, %v520_v39 }
 0x5e9   : > { %vm848_vm1 = vmpackc.low %vm524_vm15, %vm523_vm0 }
 0x5ee   : > { %850 = vmatmul.mubr.msk.bf16.gmra.mrb[4].mxu1 %vm848_vm1, %v849_v41 }
 0x6b9   : > { %v673_v47 = vpop.f32.mrb[0].mxu1 }
 0x6ba   : > { %v674_v48 = vadd.f32 %v673_v47, %v552_v45  ;;  %v675_v49 = vpop.f32.mrb[1].mxu1 }
 0x6bb   : > { %v676_v50 = vadd.f32 %v675_v49, %v556_v46  ;;  %v677_v51 = vpop.f32.mrb[2].mxu1 }
 0x6bc   : > { %692 = vst [vmem:[%s271_s28] sm:$0xff] %v674_v48  ;;  %v678_v16 = vadd.f32 %v677_v51, %v552_v45  ;;  %v679_v21 = vpop.f32.mrb[3].mxu1 }
 0x6bd   : > { %693 = vst [vmem:[%s271_s28 + $0x8] sm:$0xff] %v676_v50  ;;  %v680_v52 = vadd.f32 %v679_v21, %v556_v46 }
 0x6be   : > { %694 = vst [vmem:[%s271_s28 + $0x10] sm:$0xff] %v678_v16 }
 0x6bf   : > { %695 = vst [vmem:[%s271_s28 + $0x18] sm:$0xff] %v680_v52 }
 0x6c1   : > { %v683_v53 = vpop.f32.mrb[4].mxu1 }
 0x6c2   : > { %v684_v54 = vadd.f32 %v683_v53, %v552_v45  ;;  %v685_v55 = vpop.f32.mrb[5].mxu1 }
 0x6c3   : > { %v686_v56 = vadd.f32 %v685_v55, %v556_v46  ;;  %v687_v57 = vpop.f32.mrb[6].mxu1 }
 0x6c4   : > { %696 = vst [vmem:[%s271_s28 + $0x20] sm:$0xff] %v684_v54  ;;  %v688_v58 = vadd.f32 %v687_v57, %v552_v45  ;;  %v689_v59 = vpop.f32.mrb[7].mxu1 }
 0x6c5   : > { %697 = vst [vmem:[%s271_s28 + $0x28] sm:$0xff] %v686_v56  ;;  %v690_v60 = vadd.f32 %v689_v59, %v556_v46 }
 0x6c6   : > { %698 = vst [vmem:[%s271_s28 + $0x30] sm:$0xff] %v688_v58 }
 0x6c7   : > { %699 = vst [vmem:[%s271_s28 + $0x38] sm:$0xff] %v690_v60 }
 0x6c8   : > { %1095 = shalt.err (!%p1092_p2)
}
 0x6c9   : > { %s1096_s24 = scalar_lea.hbm %s1432_s23, 1024  ;;  %s1100_s13 = scalar_lea.hbm %s1481_s5, 2048 }
 0x6ca   : > { %p1097_p13 = scmp.ne.s32.totalorder %s1432_s23, %s1096_s24  ;;  %p1101_p4 = scmp.lt.u32.totalorder %s1432_s23, %s1481_s5 }
 0x6cb   : > { %p1102_p7 = scmp.lt.u32.totalorder %s1100_s13, %s1096_s24  ;;  %p1104_p11 = scmp.lt.u32.totalorder %s1096_s24, %s1432_s23 }
 0x6cc   : > { %p1098_p6 = pnand %p1097_p13, %p1495_p0 }
 0x6cd   : > { %p1103_p8 = por %p1102_p7, %p1101_p4 }
 0x6ce   : > { %p1099_p10 = pneg %p1098_p6 }
 0x6cf   : > { %p1105_p1 = por %p1104_p11, %p1103_p8 }
 0x6d1   : > { %p1106_p3 = pnand %p1105_p1, %p1099_p10 }
 0x6d3   : > { %1109 = shalt.err (!%p1106_p3)
}
 0x6d4   : > { %s1163_s15 = smov 256   ;;  %s1164_s30 = smov 16  }
 0x6d5   : > { %900 = dma.vmem_to_hbm [thread:$0]  (%p1495_p0), %s1427_s14, 1024, %s1432_s23, %s701_s22, %s1163_s15, %s1163_s15, %s1164_s30  }
 0x6d6 PF: > { %s730_s11 = sand.u32 1, %s1140_s18   ;;  %p1496_p5 = scmp.ne.s32.totalorder %s1486_s25, 0 }
 0x6d7   : > { %p1497_p9 = scmp.ge.s32.totalorder %s1152_s21, 2  ;;  %s731_s7 = scalar_lea.sflag [#allocation4], %s730_s11 }
 0x6d9   : > { %p914_p12 = pnand %p1497_p9, %p1496_p5 }
 0x6db   : > { %1135 = dma.done.wait (!%p914_p12), %s731_s7, 1024  }
 0x6dc   : > { %1137 = vsyncadd (!%p914_p12), %s731_s7, 4294966272  ;;  %p19_p2 = scmp.ge.s32.totalorder %s1308_s16, 4   ;;  %s1498_s18 = smov %s1144_s19 }
 0x6dd   : > { %s1499_s19 = smov %s1148_s20  ;;  %s1500_s20 = smov %s1317_s27 }
 0x6de   : > { %s1501_s21 = smov %s1308_s16  ;;  %21 = sbr.rel (!%p19_p2) target bundleno = 6 (0x6), region = 93 }
 0x6e5   :  { %736 = vsyncpa [#allocation3], 1 }
 0x6e6   :  { %738 = vsyncpa [#allocation3 + $0x1], 1 }
 0x6e7   :  { %739 = vsyncpa [#allocation6], 1 }
 0x6e8   :  { %740 = vsyncpa [#allocation4], 1 }
 0x6e9   :  { %742 = vsyncpa [#allocation4 + $0x1], 1 }

</bundles_post_ra>
